<compile_context>
chip_gen: v7x
topology: tpu7x:2x2x1
jax: 0.10.0
libtpu: 0.0.40
codegen_flags: <defaults>
</compile_context>

<pallas_src>
import functools

import jax
import jax.numpy as jnp
from jax import lax
from jax.experimental import pallas as pl
from jax.experimental.pallas import tpu as pltpu

OUT_LANES = 128  # lane-dense width of the fused layer-3 output and result slab


# --------------------------------------------------------------------------- #
# Kernel
# --------------------------------------------------------------------------- #
def _actor_critic_fused_kernel(
    state_ref, action_ref,
    w1_ref, b1_ref, w2_ref, b2_ref, w3_ref, b3_ref,
    out_ref,
    *, action_dim,
):
    hidden_dtype = w2_ref.dtype          # bf16 fast path (v6e/v7x) or f32 (v5e)

    def dense(a, w_ref, b_ref):
        # MXU matmul; accumulate in f32 regardless of weight dtype.
        return (jnp.dot(a.astype(w_ref.dtype), w_ref[...],
                        preferred_element_type=jnp.float32)
                + b_ref[...].astype(jnp.float32))

    x = state_ref[...]                                   # (T, S), pre-cast in wrapper
    # tanh runs in the hidden dtype: bf16 EUP on v6e/v7x halves the dominant
    # transcendental slot; stays f32 on v5e (no bf16 VPU/EUP there).
    h = jnp.tanh(dense(x, w1_ref, b1_ref).astype(hidden_dtype))   # (T, 128)
    h = jnp.tanh(dense(h, w2_ref, b2_ref).astype(hidden_dtype))   # (T, 128)
    out3 = dense(h, w3_ref, b3_ref)        # (T, 128) f32: logits[:A], value[A], zeros

    lane = lax.broadcasted_iota(jnp.int32, out3.shape, 1)
    valid = lane < action_dim

    # Lane-masked, numerically stable softmax over the full 128-lane tile.
    neg = jnp.float32(-1e30)
    logits = jnp.where(valid, out3, neg)
    m = jnp.max(logits, axis=-1, keepdims=True)
    z = logits - m
    e = jnp.exp(z)                                       # masked lanes underflow to 0
    denom = jnp.sum(e, axis=-1, keepdims=True)
    log_denom = jnp.log(denom)
    log_probs = z - log_denom
    probs = e * (1.0 / denom)                            # exact divide (PPO entropy)

    # Categorical(probs).log_prob(action): one-hot gather via lane compare.
    act = action_ref[...]                                # (T, 1) int32
    logp = jnp.sum(jnp.where(lane == act, log_probs, 0.0), axis=-1, keepdims=True)
    # Categorical(probs).entropy(): -sum p * log p over valid lanes only.
    ent = -jnp.sum(jnp.where(valid, probs * log_probs, 0.0), axis=-1, keepdims=True)
    # Critic value sits in lane `action_dim` of the fused layer-3 output.
    value = jnp.sum(jnp.where(lane == action_dim, out3, 0.0), axis=-1, keepdims=True)

    # Lane-dense packed output slab: lane0=logp, lane1=value, lane2=entropy.
    out_lane = lax.broadcasted_iota(jnp.int32, out_ref.shape, 1)
    out_ref[...] = jnp.where(out_lane == 0, logp,
                   jnp.where(out_lane == 1, value,
                   jnp.where(out_lane == 2, ent, 0.0)))


# --------------------------------------------------------------------------- #
# Wrapper
# --------------------------------------------------------------------------- #
def _round_up(x, m):
    return ((x + m - 1) // m) * m


def _num_tensorcores():
    """TensorCores per chip: 2 on v7x, 1 on v5e/v6e (fallback 1)."""
    try:
        kind = jax.devices()[0].device_kind.lower()
    except Exception:
        return 1
    return 2 if "7" in kind else 1


def _weight_spec(shape):
    """Grid-invariant (resident) operand; single-buffered when supported."""
    index_map = lambda i: (0,) * len(shape)
    try:
        return pl.BlockSpec(shape, index_map, pipeline_mode=pl.Buffered(1))
    except (AttributeError, TypeError):
        return pl.BlockSpec(shape, index_map)


def pack_params(p, dtype=jnp.float32):
    """Fuse actor+critic weights into lane-full / block-diagonal matrices.

    Layer 3 is padded to a full 128-lane output (logits in lanes [0:A], value
    in lane A, zeros elsewhere) and always kept in f32 so logp/value accuracy
    isn't degraded on the bf16 fast path.  Done once, outside the hot path.
    """
    S, H = p["wa1"].shape
    A = p["wa3"].shape[1]
    H2 = 2 * H
    assert A + 1 <= OUT_LANES

    w1 = jnp.concatenate([p["wa1"], p["wc1"]], axis=1)               # (S, 2H)
    b1 = jnp.concatenate([p["ba1"], p["bc1"]], axis=1)               # (1, 2H)

    w2 = jnp.zeros((H2, H2), jnp.float32)
    w2 = w2.at[:H, :H].set(p["wa2"]).at[H:, H:].set(p["wc2"])        # (2H, 2H)
    b2 = jnp.concatenate([p["ba2"], p["bc2"]], axis=1)               # (1, 2H)

    w3 = jnp.zeros((H2, OUT_LANES), jnp.float32)
    w3 = w3.at[:H, :A].set(p["wa3"]).at[H:, A:A + 1].set(p["wc3"])   # (2H, 128)
    b3 = jnp.zeros((1, OUT_LANES), jnp.float32)
    b3 = b3.at[:, :A].set(p["ba3"]).at[:, A:A + 1].set(p["bc3"])     # (1, 128)

    return dict(
        w1=w1.astype(dtype), b1=b1.astype(dtype),
        w2=w2.astype(dtype), b2=b2.astype(dtype),
        w3=w3, b3=b3,                                   # layer 3 stays f32
        action_dim=A, fused_hidden=H2, out_width=OUT_LANES)


def actor_critic_evaluate(state, action, fused, *, tile_b=None, num_cores=None):
    """Pallas equivalent of ActorCritic.evaluate(state, action).

    Returns (action_logprobs (B,), state_value (B, 1), dist_entropy (B,)).
    """
    B, S = state.shape
    A = int(fused["action_dim"])
    H2 = int(fused["fused_hidden"])
    OW = int(fused["out_width"])
    compute_dtype = fused["w1"].dtype
    sub = 16 if compute_dtype == jnp.bfloat16 else 8      # sublane packing

    if num_cores is None:
        num_cores = _num_tensorcores()
    num_cores = max(1, int(num_cores))
    if tile_b is None:
        # Large tiles amortize ~0.35us/step grid overhead on single-TC
        # v5e/v6e; the per-core split below still yields >=2 grid steps on
        # v7x (2 TCs) for mid/large batches.  VMEM at 2048 rows is a few MiB,
        # far under the 32 MiB scoped default on every generation.
        tile_b = 2048

    tile_cap = max(sub, (int(tile_b) // sub) * sub)
    per_core = _round_up(-(-B // num_cores), sub)          # split across TCs
    tile = max(sub, min(tile_cap, per_core))
    Bp = _round_up(B, tile)
    grid = (Bp // tile,)

    # Single jnp.pad (one op) instead of zeros + dynamic_update_slice; state
    # is pre-cast to the compute dtype so the kernel does no per-tile casts.
    state_p = state.astype(compute_dtype)
    action_p = action.astype(jnp.int32).reshape(B, 1)
    pad = Bp - B
    if pad:
        state_p = jnp.pad(state_p, ((0, pad), (0, 0)))
        action_p = jnp.pad(action_p, ((0, pad), (0, 0)))

    weights = (fused["w1"], fused["b1"], fused["w2"], fused["b2"],
               fused["w3"], fused["b3"])

    # Advisory cost estimate so XLA can schedule around this small kernel.
    flops = 2 * Bp * (S * H2 + H2 * H2 + H2 * OW)
    transcendentals = Bp * (2 * H2 + OW + 2)               # tanh, exp, log, recip
    bytes_accessed = (state_p.size * state_p.dtype.itemsize
                      + action_p.size * 4 + Bp * OW * 4
                      + sum(int(w.size) * w.dtype.itemsize for w in weights))

    kernel = functools.partial(_actor_critic_fused_kernel, action_dim=A)

    out = pl.pallas_call(
        kernel,
        out_shape=jax.ShapeDtypeStruct((Bp, OW), jnp.float32),
        grid=grid,
        in_specs=[
            pl.BlockSpec((tile, S), lambda i: (i, 0)),     # state tile (streamed)
            pl.BlockSpec((tile, 1), lambda i: (i, 0)),     # action tile (streamed)
            _weight_spec((S, H2)),                         # fused W1 (resident)
            _weight_spec((1, H2)),                         # fused b1
            _weight_spec((H2, H2)),                        # fused W2
            _weight_spec((1, H2)),                         # fused b2
            _weight_spec((H2, OW)),                        # fused W3 (128 lanes)
            _weight_spec((1, OW)),                         # fused b3
        ],
        out_specs=pl.BlockSpec((tile, OW), lambda i: (i, 0)),   # lane-dense slab
        compiler_params=pltpu.CompilerParams(
            dimension_semantics=("parallel",)),            # shards TCs on v7x
        cost_estimate=pl.CostEstimate(
            flops=flops, transcendentals=transcendentals,
            bytes_accessed=bytes_accessed),
    )(state_p, action_p, *weights)

    out = out[:B]
    return out[:, 0], out[:, 1:2], out[:, 2]


# --------------------------------------------------------------------------- #
# Init + pure-JAX reference
# --------------------------------------------------------------------------- #
def init_params(key, state_dim, action_dim, hidden=64):
    """Deterministic synthetic init (PyTorch-Linear-style uniform fan-in)."""
    ks = jax.random.split(key, 12)

    def lin(kw, kb, fan_in, fan_out):
        bound = 1.0 / jnp.sqrt(jnp.float32(fan_in))
        w = jax.random.uniform(kw, (fan_in, fan_out), jnp.float32, -bound, bound)
        b = jax.random.uniform(kb, (1, fan_out), jnp.float32, -bound, bound)
        return w, b

    wa1, ba1 = lin(ks[0], ks[1], state_dim, hidden)
    wa2, ba2 = lin(ks[2], ks[3], hidden, hidden)
    wa3, ba3 = lin(ks[4], ks[5], hidden, action_dim)
    wc1, bc1 = lin(ks[6], ks[7], state_dim, hidden)
    wc2, bc2 = lin(ks[8], ks[9], hidden, hidden)
    wc3, bc3 = lin(ks[10], ks[11], hidden, 1)
    return dict(wa1=wa1, ba1=ba1, wa2=wa2, ba2=ba2, wa3=wa3, ba3=ba3,
                wc1=wc1, bc1=bc1, wc2=wc2, bc2=bc2, wc3=wc3, bc3=bc3)


def _reference_evaluate(state, action, p):
    """Pure-JAX reference for correctness check."""
    h = jnp.tanh(state @ p["wa1"] + p["ba1"])
    h = jnp.tanh(h @ p["wa2"] + p["ba2"])
    logits = h @ p["wa3"] + p["ba3"]
    logp_all = jax.nn.log_softmax(logits, axis=-1)
    probs = jnp.exp(logp_all)
    logp = jnp.take_along_axis(logp_all, action[:, None], axis=-1)[:, 0]
    ent = -jnp.sum(probs * logp_all, axis=-1)
    hc = jnp.tanh(state @ p["wc1"] + p["bc1"])
    hc = jnp.tanh(hc @ p["wc2"] + p["bc2"])
    val = hc @ p["wc3"] + p["bc3"]
    return logp, val, ent


# --------------------------------------------------------------------------- #
# Main
# --------------------------------------------------------------------------- #
if __name__ == "__main__":
    STATE_DIM, ACTION_DIM, BATCH = 16, 4, 8

    key = jax.random.PRNGKey(0)
    k_params, k_state, k_action = jax.random.split(key, 3)

    params = init_params(k_params, STATE_DIM, ACTION_DIM)
    state = jax.random.normal(k_state, (BATCH, STATE_DIM), jnp.float32)
    action = jax.random.randint(k_action, (BATCH,), 0, ACTION_DIM, jnp.int32)

    # ---- f32 weights (v5e-friendly default), tight tolerances
    fused_f32 = pack_params(params, jnp.float32)
    logp, value, entropy = actor_critic_evaluate(state, action, fused_f32)
    jax.block_until_ready((logp, value, entropy))

    logp_ref, value_ref, ent_ref = _reference_evaluate(state, action, params)
    assert jnp.allclose(logp, logp_ref, atol=1e-5), "logprob mismatch"
    assert jnp.allclose(value, value_ref, atol=1e-5), "value mismatch"
    assert jnp.allclose(entropy, ent_ref, atol=1e-4), "entropy mismatch"

    # ---- larger batch exercising the batch grid (padding + multiple steps)
    B2 = 200
    k_s2, k_a2 = jax.random.split(jax.random.PRNGKey(1))
    state2 = jax.random.normal(k_s2, (B2, STATE_DIM), jnp.float32)
    action2 = jax.random.randint(k_a2, (B2,), 0, ACTION_DIM, jnp.int32)
    logp2, value2, ent2 = actor_critic_evaluate(state2, action2, fused_f32,
                                                tile_b=64)
    jax.block_until_ready((logp2, value2, ent2))
    l2r, v2r, e2r = _reference_evaluate(state2, action2, params)
    assert jnp.allclose(logp2, l2r, atol=1e-5), "grid logprob mismatch"
    assert jnp.allclose(value2, v2r, atol=1e-5), "grid value mismatch"
    assert jnp.allclose(ent2, e2r, atol=1e-4), "grid entropy mismatch"

    # ---- bf16 fast path (v6e/v7x bf16 MXU+EUP; layer 3 kept f32), loose tol
    fused_bf16 = pack_params(params, jnp.bfloat16)
    logp_b, value_b, ent_b = actor_critic_evaluate(state, action, fused_bf16)
    jax.block_until_ready((logp_b, value_b, ent_b))
    assert jnp.allclose(logp_b, logp_ref, atol=0.1), "bf16 logprob mismatch"
    assert jnp.allclose(value_b, value_ref, atol=0.1), "bf16 value mismatch"
    assert jnp.allclose(ent_b, ent_ref, atol=0.1), "bf16 entropy mismatch"

    # TODO(synk): ActorCritic.act() samples from Categorical; stochastic
    # sampling stays host-side with jax.random (not part of evaluate()).
    print("KERNEL_OK")
</pallas_src>

<mosaic_0001>
module attributes {stable_mosaic.version = 11 : i64} {
  func.func @_actor_critic_fused_kernel(%arg0: i32, %arg1: memref<8x16xf32, #tpu.memory_space<vmem>>, %arg2: memref<8x1xi32, #tpu.memory_space<vmem>>, %arg3: memref<16x128xf32, #tpu.memory_space<vmem>>, %arg4: memref<1x128xf32, #tpu.memory_space<vmem>>, %arg5: memref<128x128xf32, #tpu.memory_space<vmem>>, %arg6: memref<1x128xf32, #tpu.memory_space<vmem>>, %arg7: memref<128x128xf32, #tpu.memory_space<vmem>>, %arg8: memref<1x128xf32, #tpu.memory_space<vmem>>, %arg9: memref<8x128xf32, #tpu.memory_space<vmem>>) attributes {dimension_semantics = [#tpu.dimension_semantics<parallel>], iteration_bounds = array<i64: 1>, scalar_prefetch = 0 : i64, scratch_operands = 0 : i64, tpu.core_type = #tpu.core_type<tc>, window_params = [{transform_indices = @transform_0, window_bounds = array<i64: 8, 16>}, {transform_indices = @transform_1, window_bounds = array<i64: 8, 1>}, {pipeline_mode = #tpu.pipeline_mode<synchronous>, transform_indices = @transform_2, window_bounds = array<i64: 16, 128>}, {pipeline_mode = #tpu.pipeline_mode<synchronous>, transform_indices = @transform_3, window_bounds = array<i64: 1, 128>}, {pipeline_mode = #tpu.pipeline_mode<synchronous>, transform_indices = @transform_4, window_bounds = array<i64: 128, 128>}, {pipeline_mode = #tpu.pipeline_mode<synchronous>, transform_indices = @transform_5, window_bounds = array<i64: 1, 128>}, {pipeline_mode = #tpu.pipeline_mode<synchronous>, transform_indices = @transform_6, window_bounds = array<i64: 128, 128>}, {pipeline_mode = #tpu.pipeline_mode<synchronous>, transform_indices = @transform_7, window_bounds = array<i64: 1, 128>}, {transform_indices = @transform_8, window_bounds = array<i64: 8, 128>}]} {
    %c0 = arith.constant 0 : index
    %c0_0 = arith.constant 0 : index
    %0 = vector.load %arg1[%c0, %c0_0] : memref<8x16xf32, #tpu.memory_space<vmem>>, vector<8x16xf32>
    %c0_1 = arith.constant 0 : index
    %c0_2 = arith.constant 0 : index
    %1 = vector.load %arg3[%c0_1, %c0_2] : memref<16x128xf32, #tpu.memory_space<vmem>>, vector<16x128xf32>
    %cst = arith.constant dense<0.000000e+00> : vector<8x128xf32>
    %2 = tpu.matmul %0, %1, %cst {dimension_numbers = #tpu.dot_dimension_numbers<[1], [0], [0], [1], [0, 0, 1, 1], [], []>} : vector<8x16xf32>, vector<16x128xf32>, vector<8x128xf32> -> vector<8x128xf32>
    %c0_3 = arith.constant 0 : index
    %c0_4 = arith.constant 0 : index
    %3 = vector.load %arg4[%c0_3, %c0_4] : memref<1x128xf32, #tpu.memory_space<vmem>>, vector<1x128xf32>
    %4 = vector.broadcast %3 : vector<1x128xf32> to vector<8x128xf32>
    %5 = arith.addf %2, %4 : vector<8x128xf32>
    %6 = math.tanh %5 : vector<8x128xf32>
    %c0_5 = arith.constant 0 : index
    %c0_6 = arith.constant 0 : index
    %7 = vector.load %arg5[%c0_5, %c0_6] : memref<128x128xf32, #tpu.memory_space<vmem>>, vector<128x128xf32>
    %cst_7 = arith.constant dense<0.000000e+00> : vector<8x128xf32>
    %8 = tpu.matmul %6, %7, %cst_7 {dimension_numbers = #tpu.dot_dimension_numbers<[1], [0], [0], [1], [0, 0, 1, 1], [], []>} : vector<8x128xf32>, vector<128x128xf32>, vector<8x128xf32> -> vector<8x128xf32>
    %c0_8 = arith.constant 0 : index
    %c0_9 = arith.constant 0 : index
    %9 = vector.load %arg6[%c0_8, %c0_9] : memref<1x128xf32, #tpu.memory_space<vmem>>, vector<1x128xf32>
    %10 = vector.broadcast %9 : vector<1x128xf32> to vector<8x128xf32>
    %11 = arith.addf %8, %10 : vector<8x128xf32>
    %12 = math.tanh %11 : vector<8x128xf32>
    %c0_10 = arith.constant 0 : index
    %c0_11 = arith.constant 0 : index
    %13 = vector.load %arg7[%c0_10, %c0_11] : memref<128x128xf32, #tpu.memory_space<vmem>>, vector<128x128xf32>
    %cst_12 = arith.constant dense<0.000000e+00> : vector<8x128xf32>
    %14 = tpu.matmul %12, %13, %cst_12 {dimension_numbers = #tpu.dot_dimension_numbers<[1], [0], [0], [1], [0, 0, 1, 1], [], []>} : vector<8x128xf32>, vector<128x128xf32>, vector<8x128xf32> -> vector<8x128xf32>
    %c0_13 = arith.constant 0 : index
    %c0_14 = arith.constant 0 : index
    %15 = vector.load %arg8[%c0_13, %c0_14] : memref<1x128xf32, #tpu.memory_space<vmem>>, vector<1x128xf32>
    %16 = vector.broadcast %15 : vector<1x128xf32> to vector<8x128xf32>
    %17 = arith.addf %14, %16 : vector<8x128xf32>
    %18 = tpu.iota {dimensions = array<i32: 1>} : vector<8x128xi32>
    %c4_i32 = arith.constant 4 : i32
    %19 = vector.broadcast %c4_i32 : i32 to vector<8x128xi32>
    %20 = arith.cmpi slt, %18, %19 : vector<8x128xi32>
    %cst_15 = arith.constant -1.000000e+30 : f32
    %21 = vector.broadcast %cst_15 : f32 to vector<8x128xf32>
    %22 = arith.select %20, %17, %21 : vector<8x128xi1>, vector<8x128xf32>
    %cst_16 = arith.constant dense<0xFF800000> : vector<8xf32>
    %23 = vector.multi_reduction <maximumf>, %22, %cst_16 [1] : vector<8x128xf32> to vector<8xf32>
    %24 = vector.shape_cast %23 : vector<8xf32> to vector<8x1xf32>
    %25 = vector.broadcast %24 : vector<8x1xf32> to vector<8x128xf32>
    %26 = arith.subf %22, %25 : vector<8x128xf32>
    %27 = math.exp %26 : vector<8x128xf32>
    %cst_17 = arith.constant dense<0.000000e+00> : vector<8xf32>
    %28 = vector.multi_reduction <add>, %27, %cst_17 [1] : vector<8x128xf32> to vector<8xf32>
    %29 = vector.shape_cast %28 : vector<8xf32> to vector<8x1xf32>
    %30 = math.log %29 : vector<8x1xf32>
    %31 = vector.broadcast %30 : vector<8x1xf32> to vector<8x128xf32>
    %32 = arith.subf %26, %31 : vector<8x128xf32>
    %cst_18 = arith.constant 1.000000e+00 : f32
    %33 = vector.broadcast %cst_18 : f32 to vector<8x1xf32>
    %34 = arith.divf %33, %29 : vector<8x1xf32>
    %35 = vector.broadcast %34 : vector<8x1xf32> to vector<8x128xf32>
    %36 = arith.mulf %27, %35 : vector<8x128xf32>
    %c0_19 = arith.constant 0 : index
    %c0_20 = arith.constant 0 : index
    %37 = vector.load %arg2[%c0_19, %c0_20] : memref<8x1xi32, #tpu.memory_space<vmem>>, vector<8x1xi32>
    %38 = vector.broadcast %37 : vector<8x1xi32> to vector<8x128xi32>
    %39 = arith.cmpi eq, %18, %38 : vector<8x128xi32>
    %cst_21 = arith.constant 0.000000e+00 : f32
    %40 = vector.broadcast %cst_21 : f32 to vector<8x128xf32>
    %41 = arith.select %39, %32, %40 : vector<8x128xi1>, vector<8x128xf32>
    %cst_22 = arith.constant dense<0.000000e+00> : vector<8xf32>
    %42 = vector.multi_reduction <add>, %41, %cst_22 [1] : vector<8x128xf32> to vector<8xf32>
    %43 = vector.shape_cast %42 : vector<8xf32> to vector<8x1xf32>
    %44 = arith.mulf %36, %32 : vector<8x128xf32>
    %cst_23 = arith.constant 0.000000e+00 : f32
    %45 = vector.broadcast %cst_23 : f32 to vector<8x128xf32>
    %46 = arith.select %20, %44, %45 : vector<8x128xi1>, vector<8x128xf32>
    %cst_24 = arith.constant dense<0.000000e+00> : vector<8xf32>
    %47 = vector.multi_reduction <add>, %46, %cst_24 [1] : vector<8x128xf32> to vector<8xf32>
    %48 = vector.shape_cast %47 : vector<8xf32> to vector<8x1xf32>
    %cst_25 = arith.constant 0.000000e+00 : f32
    %49 = vector.broadcast %cst_25 : f32 to vector<8x1xf32>
    %50 = arith.subf %49, %48 : vector<8x1xf32>
    %c4_i32_26 = arith.constant 4 : i32
    %51 = vector.broadcast %c4_i32_26 : i32 to vector<8x128xi32>
    %52 = arith.cmpi eq, %18, %51 : vector<8x128xi32>
    %cst_27 = arith.constant 0.000000e+00 : f32
    %53 = vector.broadcast %cst_27 : f32 to vector<8x128xf32>
    %54 = arith.select %52, %17, %53 : vector<8x128xi1>, vector<8x128xf32>
    %cst_28 = arith.constant dense<0.000000e+00> : vector<8xf32>
    %55 = vector.multi_reduction <add>, %54, %cst_28 [1] : vector<8x128xf32> to vector<8xf32>
    %56 = vector.shape_cast %55 : vector<8xf32> to vector<8x1xf32>
    %57 = tpu.iota {dimensions = array<i32: 1>} : vector<8x128xi32>
    %c0_i32 = arith.constant 0 : i32
    %58 = vector.broadcast %c0_i32 : i32 to vector<8x128xi32>
    %59 = arith.cmpi eq, %57, %58 : vector<8x128xi32>
    %c1_i32 = arith.constant 1 : i32
    %60 = vector.broadcast %c1_i32 : i32 to vector<8x128xi32>
    %61 = arith.cmpi eq, %57, %60 : vector<8x128xi32>
    %c2_i32 = arith.constant 2 : i32
    %62 = vector.broadcast %c2_i32 : i32 to vector<8x128xi32>
    %63 = arith.cmpi eq, %57, %62 : vector<8x128xi32>
    %cst_29 = arith.constant 0.000000e+00 : f32
    %64 = vector.shape_cast %50 : vector<8x1xf32> to vector<8x1xf32>
    %65 = vector.broadcast %64 : vector<8x1xf32> to vector<8x128xf32>
    %66 = vector.broadcast %cst_29 : f32 to vector<8x128xf32>
    %67 = arith.select %63, %65, %66 : vector<8x128xi1>, vector<8x128xf32>
    %68 = vector.shape_cast %56 : vector<8x1xf32> to vector<8x1xf32>
    %69 = vector.broadcast %68 : vector<8x1xf32> to vector<8x128xf32>
    %70 = arith.select %61, %69, %67 : vector<8x128xi1>, vector<8x128xf32>
    %71 = vector.shape_cast %43 : vector<8x1xf32> to vector<8x1xf32>
    %72 = vector.broadcast %71 : vector<8x1xf32> to vector<8x128xf32>
    %73 = arith.select %59, %72, %70 : vector<8x128xi1>, vector<8x128xf32>
    %c0_30 = arith.constant 0 : index
    %c0_31 = arith.constant 0 : index
    %74 = vector.load %arg9[%c0_30, %c0_31] : memref<8x128xf32, #tpu.memory_space<vmem>>, vector<8x128xf32>
    tpu.vector_store %arg9[%c0_30, %c0_31], %73 {strides = array<i32>} : memref<8x128xf32, #tpu.memory_space<vmem>>, vector<8x128xf32>,
    return
  }
  func.func @transform_0(%arg0: i32) -> (i32, i32) {
    %c0_i32 = arith.constant 0 : i32
    %c0_i32_0 = arith.constant 0 : i32
    return %arg0, %c0_i32 : i32, i32
  }
  func.func @transform_1(%arg0: i32) -> (i32, i32) {
    %c0_i32 = arith.constant 0 : i32
    %c0_i32_0 = arith.constant 0 : i32
    return %arg0, %c0_i32 : i32, i32
  }
  func.func @transform_2(%arg0: i32) -> (i32, i32) {
    %c0_i32 = arith.constant 0 : i32
    %c0_i32_0 = arith.constant 0 : i32
    %c0_i32_1 = arith.constant 0 : i32
    return %c0_i32, %c0_i32_0 : i32, i32
  }
  func.func @transform_3(%arg0: i32) -> (i32, i32) {
    %c0_i32 = arith.constant 0 : i32
    %c0_i32_0 = arith.constant 0 : i32
    %c0_i32_1 = arith.constant 0 : i32
    return %c0_i32, %c0_i32_0 : i32, i32
  }
  func.func @transform_4(%arg0: i32) -> (i32, i32) {
    %c0_i32 = arith.constant 0 : i32
    %c0_i32_0 = arith.constant 0 : i32
    %c0_i32_1 = arith.constant 0 : i32
    return %c0_i32, %c0_i32_0 : i32, i32
  }
  func.func @transform_5(%arg0: i32) -> (i32, i32) {
    %c0_i32 = arith.constant 0 : i32
    %c0_i32_0 = arith.constant 0 : i32
    %c0_i32_1 = arith.constant 0 : i32
    return %c0_i32, %c0_i32_0 : i32, i32
  }
  func.func @transform_6(%arg0: i32) -> (i32, i32) {
    %c0_i32 = arith.constant 0 : i32
    %c0_i32_0 = arith.constant 0 : i32
    %c0_i32_1 = arith.constant 0 : i32
    return %c0_i32, %c0_i32_0 : i32, i32
  }
  func.func @transform_7(%arg0: i32) -> (i32, i32) {
    %c0_i32 = arith.constant 0 : i32
    %c0_i32_0 = arith.constant 0 : i32
    %c0_i32_1 = arith.constant 0 : i32
    return %c0_i32, %c0_i32_0 : i32, i32
  }
  func.func @transform_8(%arg0: i32) -> (i32, i32) {
    %c0_i32 = arith.constant 0 : i32
    %c0_i32_0 = arith.constant 0 : i32
    return %arg0, %c0_i32 : i32, i32
  }
}

</mosaic_0001>

<bundles_post_ra>
// kernel: tpu_custom_call.1
= control target key start
LH: loop header
LB: loop body
LE: loop exit
PB: predicated region body
PF: predicated region fallthrough
CT: control target
= control target key end

     0   :  { %13 = vsyncpa [#allocation3], 0  ;;  %s832_s0 = inlined_call_operand.hbm [shape: f32[8,16], index: 0, kind: input, shape index: {}]   ;;  %s833_s1 = inlined_call_operand.vmem [shape: s32[8,1], index: 1, kind: input, shape index: {}]   ;;  %s834_s2 = inlined_call_operand.vmem [shape: f32[16,128], index: 2, kind: input, shape index: {}]   ;;  %s835_s3 = inlined_call_operand.vmem [shape: f32[1,128], index: 3, kind: input, shape index: {}]   ;;  %s836_s4 = inlined_call_operand.hbm [shape: f32[128,128], index: 4, kind: input, shape index: {}]   ;;  %s837_s5 = inlined_call_operand.vmem [shape: f32[1,128], index: 5, kind: input, shape index: {}]   ;;  %s838_s6 = inlined_call_operand.hbm [shape: f32[128,128], index: 6, kind: input, shape index: {}]   ;;  %s839_s7 = inlined_call_operand.vmem [shape: f32[1,128], index: 7, kind: input, shape index: {}]   ;;  %s840_s8 = inlined_call_operand.hbm [shape: f32[8,128], index: 8, kind: output, shape index: {}]  }
   0x1   :  { %14 = vsyncpa [#allocation6], 0 }
   0x2   :  { %15 = vsyncpa [#allocation4], 0  ;;  %s683_s27 = smov [#allocation5]   ;;  %s589_s9 = scalar_lea.hbm %s836_s4, 2048 }
   0x3   :  { %s37_s28 = sshll.u32 %s683_s27, 4  ;;  %p590_p0 = scmp.ne.s32.totalorder %s836_s4, %s589_s9  ;;  %s38_s28 = int_to_ptr.vmem [resolvable:$true] %s37_s28 }
   0x4   :  { %p593_p1 = scmp.lt.u32.totalorder %s589_s9, %s836_s4 }
   0x6   :  { %p595_p2 = pnand %p593_p1, %p590_p0 }
   0x8   :  { %598 = shalt.err (!%p595_p2)
}
   0x9   :  { %s599_s14 = scalar_lea.vmem %s38_s28, 2048  ;;  %p604_p4 = scmp.lt.s32.totalorder %s38_s28, %s38_s28 }
   0xa   :  { %p600_p3 = scmp.ne.s32.totalorder %s38_s28, %s599_s14  ;;  %p605_p5 = scmp.lt.s32.totalorder %s599_s14, %s599_s14 }
   0xc   :  { %p606_p6 = por %p605_p5, %p604_p4 }
   0xe   :  { %p607_p7 = pnand %p606_p6, %p600_p3 }
  0x10   :  { %610 = shalt.err (!%p607_p7)
}
  0x11   :  { %s684_s15 = smov 128   ;;  %s685_s16 = smov 8  }
  0x12   :  { %43 = dma.hbm_to_vmem [thread:$0]  %s836_s4, 2048, %s38_s28, [#allocation6], %s684_s15, %s684_s15, %s685_s16  }
  0x13   :  { %s686_s19 = smov [#allocation2]   ;;  %s687_s21 = smov [#allocation7]  }
  0x14   :  { %s22_s20 = sshll.u32 %s686_s19, 4  ;;  %s51_s22 = sshll.u32 %s687_s21, 4  ;;  %s23_s20 = int_to_ptr.vmem [resolvable:$true] %s22_s20  ;;  %s52_s22 = int_to_ptr.vmem [resolvable:$true] %s51_s22 }
  0x15   :  { %s611_s25 = scalar_lea.hbm %s832_s0, 128 }
  0x16   :  { %p612_p8 = scmp.ne.s32.totalorder %s832_s0, %s611_s25  ;;  %p615_p9 = scmp.lt.u32.totalorder %s611_s25, %s832_s0 }
  0x18   :  { %p617_p10 = pnand %p615_p9, %p612_p8 }
  0x1a   :  { %620 = shalt.err (!%p617_p10)
}
  0x1b   :  { %s621_s4 = scalar_lea.vmem %s23_s20, 128  ;;  %p626_p12 = scmp.lt.s32.totalorder %s23_s20, %s23_s20 }
  0x1c   :  { %p622_p11 = scmp.ne.s32.totalorder %s23_s20, %s621_s4  ;;  %p627_p13 = scmp.lt.s32.totalorder %s621_s4, %s621_s4 }
  0x1e   :  { %p628_p0 = por %p627_p13, %p626_p12 }
  0x20   :  { %p629_p1 = pnand %p628_p0, %p622_p11 }
  0x22   :  { %632 = shalt.err (!%p629_p1)
}
  0x23   :  { %25 = dma.hbm_to_vmem [thread:$0]  %s832_s0, 128, %s23_s20, [#allocation3]  }
  0x24   :  { %s633_s12 = scalar_lea.hbm %s838_s6, 2048 }
  0x25   :  { %p634_p2 = scmp.ne.s32.totalorder %s838_s6, %s633_s12  ;;  %p637_p3 = scmp.lt.u32.totalorder %s633_s12, %s838_s6 }
  0x27   :  { %p639_p4 = pnand %p637_p3, %p634_p2 }
  0x29   :  { %642 = shalt.err (!%p639_p4)
}
  0x2a   :  { %s643_s19 = scalar_lea.vmem %s52_s22, 2048  ;;  %p648_p6 = scmp.lt.s32.totalorder %s52_s22, %s52_s22 }
  0x2b   :  { %p644_p5 = scmp.ne.s32.totalorder %s52_s22, %s643_s19  ;;  %p649_p7 = scmp.lt.s32.totalorder %s643_s19, %s643_s19 }
  0x2d   :  { %p650_p8 = por %p649_p7, %p648_p6 }
  0x2f   :  { %p651_p9 = pnand %p650_p8, %p644_p5 }
  0x31   :  { %654 = shalt.err (!%p651_p9)
}
  0x32   :  { %57 = dma.hbm_to_vmem [thread:$0]  %s838_s6, 2048, %s52_s22, [#allocation6], %s684_s15, %s684_s15, %s685_s16  }
  0x33   :  { %677 = dma.done.wait [#allocation3], 128  }
  0x34   :  { %678 = vsyncadd [#allocation3], 4294967168 }
  0x35   :  { %679 = dma.done.wait [#allocation6], 4096  }
  0x36   :  { %680 = vsyncadd [#allocation6], 4294963200  ;;  %v688_v0 = vmov 0.0|0.0   ;;  %vm689_vm0 = vmmov 0   ;;  %v690_v1 = vmov 0.0   ;;  %v70_v2 = vld [vmem:[%s834_s2] sm:$0xff] }
  0x37   :  { %516 = vmatprep.subr.bf16.mxu0 %v688_v0  ;;  %443 = vmatprep.mubr.msk.f32.mxu0 %vm689_vm0, %v690_v1  ;;  %v71_v3 = vld [vmem:[%s834_s2 + $0x8] sm:$0xff]  ;;  %v155_v6 = vld [vmem:[#allocation5 + $0x8] sm:$0xff]  ;;  %v156_v7 = vld [vmem:[#allocation5 + $0x10] sm:$0xff]  ;;  %vm79_vm1 = vcmask 130048  }
  0x38   :  { %519 = vmatprep.subr.bf16.mxu1 %v688_v0  ;;  %478 = vmatprep.mubr.msk.f32.mxu1 %vm689_vm0, %v690_v1  ;;  %v517_v4 = vpack.c.bf16 %v71_v3, %v70_v2  ;;  %v154_v5 = vld [vmem:[#allocation5] sm:$0xff]  ;;  %v157_v9 = vld [vmem:[#allocation5 + $0x18] sm:$0xff]  ;;  %v159_v13 = vld [vmem:[#allocation5 + $0x28] sm:$0xff] }
  0x39   :  { %v520_v8 = vpack.c.bf16 %v155_v6, %v154_v5  ;;  %v69_v10 = vld [vmem:[#allocation2] sm:$0xff]  ;;  %v523_v11 = vpack.c.bf16 %v157_v9, %v156_v7  ;;  %v158_v12 = vld [vmem:[#allocation5 + $0x20] sm:$0xff]  ;;  %v160_v15 = vld [vmem:[#allocation5 + $0x30] sm:$0xff] }
  0x3a   :  { %518 = vmatpush3.bf16.msra.mxu0 %v517_v4  ;;  %v526_v14 = vpack.c.bf16 %v159_v13, %v158_v12  ;;  %v161_v16 = vld [vmem:[#allocation5 + $0x38] sm:$0xff]  ;;  %v162_v18 = vld [vmem:[#allocation5 + $0x40] sm:$0xff]  ;;  %v163_v19 = vld [vmem:[#allocation5 + $0x48] sm:$0xff] }
  0x3b   :  { %521 = vmatpush3.bf16.msra.mxu1 %v520_v8  ;;  %543 = vmatprep.subr.bf16.mxu0 %v688_v0  ;;  %v529_v17 = vpack.c.bf16 %v161_v16, %v160_v15  ;;  %v532_v20 = vpack.c.bf16 %v163_v19, %v162_v18  ;;  %v164_v21 = vld [vmem:[#allocation5 + $0x50] sm:$0xff]  ;;  %v165_v22 = vld [vmem:[#allocation5 + $0x58] sm:$0xff]  ;;  %v166_v24 = vld [vmem:[#allocation5 + $0x60] sm:$0xff]  ;;  %v691_v8 = vmov 0  }
  0x3c   :  { %522 = vmatprep.subr.bf16.mxu1 %v688_v0  ;;  %v535_v23 = vpack.c.bf16 %v165_v22, %v164_v21  ;;  %v167_v25 = vld [vmem:[#allocation5 + $0x68] sm:$0xff]  ;;  %v168_v27 = vld [vmem:[#allocation5 + $0x70] sm:$0xff]  ;;  %v169_v28 = vld [vmem:[#allocation5 + $0x78] sm:$0xff]  ;;  %577 = vset.pattern.permute.xlu1 %v691_v8 }
  0x3d   :  { %444 = vmatmul.mubr.msk.f32.vlgmr.msra.gmra.mrb[0].mxu0 %vm79_vm1, %v69_v10  ;;  %v538_v26 = vpack.c.bf16 %v167_v25, %v166_v24  ;;  %v541_v29 = vpack.c.bf16 %v169_v28, %v168_v27  ;;  %v248_v30 = vld [vmem:[#allocation7] sm:$0xff]  ;;  %v249_v31 = vld [vmem:[#allocation7 + $0x8] sm:$0xff]  ;;  %v250_v32 = vld [vmem:[#allocation7 + $0x10] sm:$0xff]  ;;  %578 = vset.pattern.permute.xlu0 %v691_v8 }
  0x3e   :  { %513 = vmatprep.mubr.msk.f32.mxu0 %vm689_vm0, %v690_v1  ;;  %v544_v33 = vpack.c.bf16 %v249_v31, %v248_v30  ;;  %v251_v34 = vld [vmem:[#allocation7 + $0x18] sm:$0xff]  ;;  %v252_v36 = vld [vmem:[#allocation7 + $0x20] sm:$0xff]  ;;  %v253_v37 = vld [vmem:[#allocation7 + $0x28] sm:$0xff]  ;;  %v341_v1 = vlaneseq }
  0x3f   :  { %524 = vmatpush3.bf16.msra.mxu1 %v523_v11  ;;  %v547_v35 = vpack.c.bf16 %v251_v34, %v250_v32  ;;  %v550_v38 = vpack.c.bf16 %v253_v37, %v252_v36  ;;  %v254_v39 = vld [vmem:[#allocation7 + $0x30] sm:$0xff]  ;;  %v255_v40 = vld [vmem:[#allocation7 + $0x38] sm:$0xff]  ;;  %v256_v42 = vld [vmem:[#allocation7 + $0x40] sm:$0xff] }
  0x40   :  { %525 = vmatprep.subr.bf16.mxu1 %v688_v0  ;;  %545 = vmatpush3.bf16.msra.mxu0 %v544_v33  ;;  %v553_v41 = vpack.c.bf16 %v255_v40, %v254_v39  ;;  %v257_v43 = vld [vmem:[#allocation7 + $0x48] sm:$0xff]  ;;  %v398_v45 = vld [vmem:[%s835_s3] ss:$0 sm:$0xff]  ;;  %v258_v50 = vld [vmem:[#allocation7 + $0x50] sm:$0xff]  ;;  %v342_v2 = vand.u32 127, %v341_v1 }
  0x41   :  { %546 = vmatprep.subr.bf16.mxu0 %v688_v0  ;;  %v556_v44 = vpack.c.bf16 %v257_v43, %v256_v42  ;;  %v259_v51 = vld [vmem:[#allocation7 + $0x58] sm:$0xff]  ;;  %v260_v53 = vld [vmem:[#allocation7 + $0x60] sm:$0xff]  ;;  %v261_v54 = vld [vmem:[#allocation7 + $0x68] sm:$0xff] }
  0x42   :  { %v559_v52 = vpack.c.bf16 %v259_v51, %v258_v50  ;;  %v562_v55 = vpack.c.bf16 %v261_v54, %v260_v53  ;;  %v262_v56 = vld [vmem:[#allocation7 + $0x70] sm:$0xff]  ;;  %v263_v57 = vld [vmem:[#allocation7 + $0x78] sm:$0xff]  ;;  %vm343_vm2 = vcmp.lt.s32.totalorder %v342_v2, 4  ;;  %vm371_vm3 = vcmp.eq.s32.totalorder %v342_v2, 4 }
  0x43   :  { %527 = vmatpush3.bf16.msra.mxu1 %v526_v14  ;;  %v565_v58 = vpack.c.bf16 %v263_v57, %v262_v56  ;;  %v400_v59 = vld [vmem:[%s837_s5] ss:$0 sm:$0xff]  ;;  %vm377_vm5 = vcmp.eq.s32.totalorder %v342_v2, 2  ;;  %vm376_vm6 = vcmp.eq.s32.totalorder %v342_v2, 1  ;;  %vm375_vm7 = vcmp.eq.s32.totalorder %v342_v2, 0 }
  0x44   :  { %528 = vmatprep.subr.bf16.mxu1 %v688_v0  ;;  %548 = vmatpush3.bf16.msra.mxu0 %v547_v35  ;;  %v401_v3 = vld [vmem:[%s839_s7] ss:$0 sm:$0xff] }
  0x45   :  { %549 = vmatprep.subr.bf16.mxu0 %v688_v0  ;;  %v358_v7 = vld [vmem:[%s833_s1] sm:$0xff]  ;;  %s692_s1 = smov [#allocation8]  }
  0x46   :  { %360 = vperm.xlu1 %577, %v358_v7   ;;  %s388_s7 = sshll.u32 %s692_s1, 4  ;;  %s389_s7 = int_to_ptr.vmem [resolvable:$true] %s388_s7 }
  0x47   :  { %530 = vmatpush3.bf16.msra.mxu1 %v529_v17  ;;  %s655_s27 = scalar_lea.vmem %s389_s7, 128  ;;  %p660_p11 = scmp.lt.s32.totalorder %s389_s7, %s389_s7 }
  0x48   :  { %531 = vmatprep.subr.bf16.mxu1 %v688_v0  ;;  %551 = vmatpush3.bf16.msra.mxu0 %v550_v38  ;;  %p656_p10 = scmp.ne.s32.totalorder %s389_s7, %s655_s27  ;;  %p661_p12 = scmp.lt.s32.totalorder %s655_s27, %s655_s27 }
  0x49   :  { %552 = vmatprep.subr.bf16.mxu0 %v688_v0 }
  0x4a   :  { %p662_p13 = por %p661_p12, %p660_p11 }
  0x4b   :  { %533 = vmatpush3.bf16.msra.mxu1 %v532_v20 }
  0x4c   :  { %534 = vmatprep.subr.bf16.mxu1 %v688_v0  ;;  %554 = vmatpush3.bf16.msra.mxu0 %v553_v41  ;;  %p663_p0 = pnand %p662_p13, %p656_p10 }
  0x4d   :  { %555 = vmatprep.subr.bf16.mxu0 %v688_v0 }
  0x4f   :  { %536 = vmatpush3.bf16.msra.mxu1 %v535_v23 }
  0x50   :  { %537 = vmatprep.subr.bf16.mxu1 %v688_v0  ;;  %557 = vmatpush3.bf16.msra.mxu0 %v556_v44 }
  0x51   :  { %558 = vmatprep.subr.bf16.mxu0 %v688_v0 }
  0x53   :  { %539 = vmatpush3.bf16.msra.mxu1 %v538_v26 }
  0x54   :  { %540 = vmatprep.subr.bf16.mxu1 %v688_v0  ;;  %560 = vmatpush3.bf16.msra.mxu0 %v559_v52 }
  0x55   :  { %561 = vmatprep.subr.bf16.mxu0 %v688_v0 }
  0x57   :  { %542 = vmatpush3.bf16.msra.mxu1 %v541_v29 }
  0x58   :  { %563 = vmatpush3.bf16.msra.mxu0 %v562_v55 }
  0x59   :  { %564 = vmatprep.subr.bf16.mxu0 %v688_v0 }
  0x5c   :  { %566 = vmatpush3.bf16.msra.mxu0 %v565_v58 }
  0xc5   :  { %v361_v15 = vpop.permute.xlu1 %360 }
  0xc6   :  { %vm362_vm4 = vcmp.eq.s32.totalorder %v342_v2, %v361_v15 }
 0x110   :  { %v149_v46 = vpop.f32.mrb[0].mxu0 }
 0x111   :  { %v150_v47 = vadd.f32 %v398_v45, %v149_v46  ;;  %v445_v48 = vpop.f32.mrb[1].mxu0 }
 0x113   :  { %579 = vtanh.f32 %v150_v47 }
 0x11d   :  { %v580_v49 = vpop.eup %579 }
 0x11e   :  { %479 = vmatmul.mubr.f32.vlgmr.msra.gmra.mrb[0].mxu1 %v580_v49 }
 0x1f1   :  { %v243_v60 = vpop.f32.mrb[0].mxu1 }
 0x1f2   :  { %v244_v61 = vadd.f32 %v400_v59, %v243_v60  ;;  %v480_v62 = vpop.f32.mrb[1].mxu1 }
 0x1f4   :  { %581 = vtanh.f32 %v244_v61 }
 0x1fe   :  { %v582_v63 = vpop.eup %581 }
 0x1ff   :  { %514 = vmatmul.mubr.f32.vlgmr.msra.gmra.mrb[2].mxu0 %v582_v63 }
 0x2d2   :  { %v337_v4 = vpop.f32.mrb[2].mxu0 }
 0x2d3   :  { %v338_v0 = vadd.f32 %v401_v3, %v337_v4  ;;  %v515_v5 = vpop.f32.mrb[3].mxu0 }
 0x2d5   :  { %v344_v6 = vsel %vm343_vm2, %v338_v0, -1e+30  ;;  %v372_v13 = vsel %vm371_vm3, %v338_v0, 0.0 }
 0x2d6   :  { %345 = vmax.xlane.f32.xlu0 %v344_v6 }
 0x363   :  { %v346_v9 = vpop.xlane.xlu0 %345 }
 0x364   :  { %v347_v10 = vsub.f32 %v344_v6, %v346_v9 }
 0x366   :  { %v348_v11 = vmul.f32 1.442695, %v347_v10 }
 0x368   :  { %583 = vpow2.f32 %v348_v11 }
 0x372   :  { %v584_v12 = vpop.eup %583 }
 0x373   :  { %350 = vadd.xlane.f32.xlu0 %v584_v12 }
 0x377   :  { %373 = vadd.xlane.f32.xlu0 %v372_v13 }
 0x400   :  { %v351_v14 = vpop.xlane.xlu0 %350 }
 0x401   :  { %585 = vlog2.f32 %v351_v14 }
 0x402   :  { %587 = vrcp.f32 %v351_v14 }
 0x404   :  { %v374_v24 = vpop.xlane.xlu0 %373 }
 0x40b   :  { %v586_v16 = vpop.eup %585 }
 0x40c   :  { %v588_v17 = vpop.eup %587  ;;  %v353_v18 = vmul.f32 0.6931472, %v586_v16 }
 0x40d   :  { %v357_v20 = vmul.f32 %v588_v17, %v584_v12 }
 0x40e   :  { %v354_v19 = vsub.f32 %v347_v10, %v353_v18 }
 0x410   :  { %v363_v21 = vsel %vm362_vm4, %v354_v19, 0.0  ;;  %v366_v22 = vmul.f32 %v357_v20, %v354_v19 }
 0x411   :  { %364 = vadd.xlane.f32.xlu0 %v363_v21 }
 0x412   :  { %v367_v23 = vsel %vm343_vm2, %v366_v22, 0.0 }
 0x413   :  { %368 = vadd.xlane.f32.xlu1 %v367_v23 }
 0x49e   :  { %v365_v28 = vpop.xlane.xlu0 %364 }
 0x4a0   :  { %v369_v25 = vpop.xlane.xlu1 %368 }
 0x4a1   :  { %v370_v26 = vsub.f32 0.0, %v369_v25 }
 0x4a3   :  { %v378_v27 = vsel %vm377_vm5, %v370_v26, 0.0 }
 0x4a4   :  { %v379_v29 = vsel %vm376_vm6, %v374_v24, %v378_v27 }
 0x4a5   :  { %v380_v30 = vsel %vm375_vm7, %v365_v28, %v379_v29 }
 0x4a6   :  { %381 = vst [vmem:[#allocation8] sm:$0xff] %v380_v30 }
 0x4a7   :  { %666 = shalt.err (!%p663_p0)
}
 0x4a8   :  { %s667_s4 = scalar_lea.hbm %s840_s8, 128 }
 0x4a9   :  { %p668_p1 = scmp.ne.s32.totalorder %s840_s8, %s667_s4  ;;  %p671_p2 = scmp.lt.u32.totalorder %s667_s4, %s840_s8 }
 0x4ab   :  { %p673_p3 = pnand %p671_p2, %p668_p1 }
 0x4ad   :  { %676 = shalt.err (!%p673_p3)
}
 0x4ae   :  { %391 = dma.vmem_to_hbm [thread:$0]  %s389_s7, 128, %s840_s8, [#allocation4]  }
 0x4af   :  { %681 = dma.done.wait [#allocation4], 128  }
 0x4b0   :  { %682 = vsyncadd [#allocation4], 4294967168 }
 0x4b1   :  { %395 = vsyncpa [#allocation3], 1 }
 0x4b2   :  { %396 = vsyncpa [#allocation6], 1 }
 0x4b3   :  { %397 = vsyncpa [#allocation4], 1 }

</bundles_post_ra>
